<compile_context>
chip_gen: v7x
topology: tpu7x:2x2x1
jax: 0.10.0
libtpu: 0.0.40
codegen_flags: <defaults>
</compile_context>

<pallas_src>
import functools

import jax
import jax.numpy as jnp
from jax.experimental import pallas as pl
from jax.experimental.pallas import tpu as pltpu

LANE = 128
SUB = 8
# 512 rows/tile keeps the double-buffered input footprint (~3.4 MiB at C=8,
# f32) comfortably inside every generation's scoped VMEM while amortizing the
# ~0.35 us per-grid-step overhead; raise to 1024 on v6e/v7x if a trace still
# shows exposed step overhead.
_TR_CAP = 512
_VMEM_LIMIT_BYTES = 32 * 1024 * 1024


def _coloss_kernel(conf_ref, inst_ref, off_ref, goff_ref,
                   ent_ref, sq_ref, cnt_ref, *, C, TR, bg_weight):
    lab = inst_ref[0, 0, :, :]                     # (TR, LANE) labels (float or int)
    is_bg = lab == 0

    # ---- confidence loss: gather conf[label] via a static channel loop ----
    # NOTE: labels are assumed to lie in [0, C); out-of-range labels fall
    # through to the 1e-37 clamp (-log ~ 85) rather than torch.gather UB.
    gathered = jnp.zeros((TR, LANE), jnp.float32)
    for c in range(C):                             # C is small & static
        ch = conf_ref[0, c, :, :].astype(jnp.float32)
        gathered = jnp.where(lab == c, ch, gathered)
    gathered = jnp.maximum(gathered, jnp.float32(1e-37))   # guard -log(0)
    ent = -jnp.log(gathered)
    ent = jnp.where(is_bg, ent * bg_weight, ent)

    # ---- offset loss: squared error over non-background pixels ----
    d0 = goff_ref[0, 0, :, :].astype(jnp.float32) - off_ref[0, 0, :, :].astype(jnp.float32)
    d1 = goff_ref[0, 1, :, :].astype(jnp.float32) - off_ref[0, 1, :, :].astype(jnp.float32)
    sq = d0 * d0 + d1 * d1
    fg = jnp.logical_not(is_bg)

    # ---- collapse (TR,128) -> (8,128): leading-axis sum = pure VPU adds ----
    g = TR // SUB
    ent8 = jnp.sum(ent.reshape(g, SUB, LANE), axis=0)
    sq8 = jnp.sum(jnp.where(fg, sq, 0.0).reshape(g, SUB, LANE), axis=0)
    cnt8 = jnp.sum(fg.astype(jnp.float32).reshape(g, SUB, LANE), axis=0)

    # Each (b, t) output block is written exactly once -> no accumulation, no
    # init phase, and both grid axes can be marked "parallel".
    ent_ref[0, 0, :, :] = ent8
    sq_ref[0, 0, :, :] = sq8
    cnt_ref[0, 0, :, :] = cnt8


def coloss(confidence, offset, instance, gt_offset,
           coeff=(1.0, 1.0, 1.0), bg_weight=0.4):
    """All inputs NCHW (same layout the PyTorch module receives).

    confidence: (B, C, H, W) per-pixel class distribution (softmax output)
    offset:     (B, 2, H, W)
    instance:   (B, 1, H, W) class-label map (0 = background), float or int
    gt_offset:  (B, 2, H, W)

    Inputs may be bf16 / int; they are upcast to f32 after the VMEM load.
    """
    B, C, H, W = confidence.shape
    assert offset.shape == (B, 2, H, W)
    assert instance.shape == (B, 1, H, W)
    assert gt_offset.shape == (B, 2, H, W)

    S = H * W
    r_min = (S + LANE - 1) // LANE                 # rows of 128 lanes needed
    if r_min <= _TR_CAP:
        TR = ((r_min + SUB - 1) // SUB) * SUB      # single tile, multiple of 8
    else:
        TR = _TR_CAP
    n_tiles = (r_min + TR - 1) // TR
    R = n_tiles * TR                               # padded row count
    S_pad = R * LANE

    def _flatten(x, c, pad_value):
        x = x.reshape(B, c, S)
        if S_pad != S:
            x = jnp.pad(x, ((0, 0), (0, 0), (0, S_pad - S)),
                        constant_values=pad_value)
        return x.reshape(B, c, R, LANE)

    # Padded positions are self-cancelling: confidence -> 1.0 so -log(1) == 0,
    # labels -> 0 (background) so they never enter the offset mask.  No
    # in-kernel tail masking is needed on any tile.
    conf = _flatten(confidence, C, 1.0)
    inst = _flatten(instance, 1, 0)
    off = _flatten(offset, 2, 0)
    goff = _flatten(gt_offset, 2, 0)

    kernel = functools.partial(_coloss_kernel, C=C, TR=TR,
                               bg_weight=float(bg_weight))

    part_shape = jax.ShapeDtypeStruct((B, n_tiles, SUB, LANE), jnp.float32)
    out_block = pl.BlockSpec((1, 1, SUB, LANE), lambda b, t: (b, t, 0, 0))

    ent_part, sq_part, cnt_part = pl.pallas_call(
        kernel,
        out_shape=(part_shape, part_shape, part_shape),
        grid_spec=pltpu.PrefetchScalarGridSpec(
            num_scalar_prefetch=0,
            grid=(B, n_tiles),
            in_specs=[
                pl.BlockSpec((1, C, TR, LANE), lambda b, t: (b, 0, t, 0)),
                pl.BlockSpec((1, 1, TR, LANE), lambda b, t: (b, 0, t, 0)),
                pl.BlockSpec((1, 2, TR, LANE), lambda b, t: (b, 0, t, 0)),
                pl.BlockSpec((1, 2, TR, LANE), lambda b, t: (b, 0, t, 0)),
            ],
            out_specs=[out_block, out_block, out_block],
        ),
        compiler_params=pltpu.CompilerParams(
            dimension_semantics=("parallel", "parallel"),
            vmem_limit_bytes=_VMEM_LIMIT_BYTES),
    )(conf, inst, off, goff)

    # Tiny final combine (cross-lane reduce + per-batch guards) in plain JAX.
    conf_loss = jnp.sum(ent_part) / jnp.float32(B * H * W)
    sq_b = jnp.sum(sq_part, axis=(1, 2, 3))                 # (B,)
    cnt_b = jnp.sum(cnt_part, axis=(1, 2, 3))               # (B,)
    off_b = jnp.where(cnt_b > 0, sq_b / jnp.maximum(cnt_b, 1.0), 0.0)
    off_loss = jnp.sum(off_b) / jnp.float32(B)
    return coeff[0] * conf_loss + coeff[1] * off_loss


def _coloss_ref(confidence, offset, instance, gt_offset,
                coeff=(1.0, 1.0, 1.0), bg_weight=0.4):
    """Pure-JAX reference mirroring the PyTorch forward."""
    B, C, H, W = confidence.shape
    conf = jnp.transpose(confidence, (0, 2, 3, 1))           # NHWC
    off = jnp.transpose(offset, (0, 2, 3, 1))
    inst = jnp.transpose(instance, (0, 2, 3, 1))
    goff = jnp.transpose(gt_offset, (0, 2, 3, 1))

    idx = inst.astype(jnp.int32)
    gathered = jnp.take_along_axis(conf, idx, axis=3)         # (B,H,W,1)
    ent = -jnp.log(gathered)
    ent = jnp.where(idx == 0, ent * bg_weight, ent)
    conf_loss = jnp.mean(ent)

    mask = (idx[..., 0] != 0)
    sq = jnp.sum((goff - off) ** 2, axis=-1)                  # (B,H,W)
    sq_sum = jnp.sum(jnp.where(mask, sq, 0.0), axis=(1, 2))   # (B,)
    cnt = jnp.sum(mask.astype(jnp.float32), axis=(1, 2))      # (B,)
    per_b = jnp.where(cnt > 0, sq_sum / jnp.maximum(cnt, 1.0), 0.0)
    off_loss = jnp.sum(per_b) / B

    return coeff[0] * conf_loss + coeff[1] * off_loss


if __name__ == "__main__":
    key = jax.random.PRNGKey(0)
    k1, k2, k3, k4 = jax.random.split(key, 4)

    B, C, H, W = 2, 5, 16, 16   # C = num lane classes (incl. background 0)

    logits = jax.random.normal(k1, (B, C, H, W), jnp.float32)
    confidence = jax.nn.softmax(logits, axis=1)               # valid distribution per pixel
    instance = jax.random.randint(k2, (B, 1, H, W), 0, C).astype(jnp.float32)
    offset = jax.random.normal(k3, (B, 2, H, W), jnp.float32)
    gt_offset = jax.random.normal(k4, (B, 2, H, W), jnp.float32)

    loss = coloss(confidence, offset, instance, gt_offset)
    loss = jax.block_until_ready(loss)

    ref = _coloss_ref(confidence, offset, instance, gt_offset)
    assert jnp.allclose(loss, ref, rtol=1e-4, atol=1e-5), (loss, ref)

    print("KERNEL_OK")
</pallas_src>

<mosaic_0001>
module attributes {stable_mosaic.version = 11 : i64} {
  func.func @_coloss_kernel(%arg0: i32, %arg1: i32, %arg2: memref<1x5x8x128xf32, #tpu.memory_space<vmem>>, %arg3: memref<1x1x8x128xf32, #tpu.memory_space<vmem>>, %arg4: memref<1x2x8x128xf32, #tpu.memory_space<vmem>>, %arg5: memref<1x2x8x128xf32, #tpu.memory_space<vmem>>, %arg6: memref<1x1x8x128xf32, #tpu.memory_space<vmem>>, %arg7: memref<1x1x8x128xf32, #tpu.memory_space<vmem>>, %arg8: memref<1x1x8x128xf32, #tpu.memory_space<vmem>>) attributes {dimension_semantics = [#tpu.dimension_semantics<parallel>, #tpu.dimension_semantics<parallel>], iteration_bounds = array<i64: 2, 1>, scalar_prefetch = 0 : i64, scratch_operands = 0 : i64, tpu.core_type = #tpu.core_type<tc>, window_params = [{transform_indices = @transform_0, window_bounds = array<i64: 1, 5, 8, 128>}, {transform_indices = @transform_1, window_bounds = array<i64: 1, 1, 8, 128>}, {transform_indices = @transform_2, window_bounds = array<i64: 1, 2, 8, 128>}, {transform_indices = @transform_3, window_bounds = array<i64: 1, 2, 8, 128>}, {transform_indices = @transform_4, window_bounds = array<i64: 1, 1, 8, 128>}, {transform_indices = @transform_5, window_bounds = array<i64: 1, 1, 8, 128>}, {transform_indices = @transform_6, window_bounds = array<i64: 1, 1, 8, 128>}]} {
    %c0 = arith.constant 0 : index
    %c0_0 = arith.constant 0 : index
    %c0_1 = arith.constant 0 : index
    %c0_2 = arith.constant 0 : index
    %0 = vector.load %arg3[%c0, %c0_0, %c0_1, %c0_2] : memref<1x1x8x128xf32, #tpu.memory_space<vmem>>, vector<1x1x8x128xf32>
    %1 = vector.shape_cast %0 : vector<1x1x8x128xf32> to vector<8x128xf32>
    %cst = arith.constant 0.000000e+00 : f32
    %2 = vector.broadcast %cst : f32 to vector<8x128xf32>
    %3 = arith.cmpf oeq, %1, %2 : vector<8x128xf32>
    %cst_3 = arith.constant 0.000000e+00 : f32
    %4 = vector.broadcast %cst_3 : f32 to vector<8x128xf32>
    %c0_4 = arith.constant 0 : index
    %c0_5 = arith.constant 0 : index
    %c0_6 = arith.constant 0 : index
    %c0_7 = arith.constant 0 : index
    %5 = vector.load %arg2[%c0_4, %c0_5, %c0_6, %c0_7] : memref<1x5x8x128xf32, #tpu.memory_space<vmem>>, vector<1x1x8x128xf32>
    %6 = vector.shape_cast %5 : vector<1x1x8x128xf32> to vector<8x128xf32>
    %cst_8 = arith.constant 0.000000e+00 : f32
    %7 = vector.broadcast %cst_8 : f32 to vector<8x128xf32>
    %8 = arith.cmpf oeq, %1, %7 : vector<8x128xf32>
    %9 = arith.select %8, %6, %4 : vector<8x128xi1>, vector<8x128xf32>
    %c0_9 = arith.constant 0 : index
    %c1 = arith.constant 1 : index
    %c0_10 = arith.constant 0 : index
    %c0_11 = arith.constant 0 : index
    %10 = vector.load %arg2[%c0_9, %c1, %c0_10, %c0_11] : memref<1x5x8x128xf32, #tpu.memory_space<vmem>>, vector<1x1x8x128xf32>
    %11 = vector.shape_cast %10 : vector<1x1x8x128xf32> to vector<8x128xf32>
    %cst_12 = arith.constant 1.000000e+00 : f32
    %12 = vector.broadcast %cst_12 : f32 to vector<8x128xf32>
    %13 = arith.cmpf oeq, %1, %12 : vector<8x128xf32>
    %14 = arith.select %13, %11, %9 : vector<8x128xi1>, vector<8x128xf32>
    %c0_13 = arith.constant 0 : index
    %c2 = arith.constant 2 : index
    %c0_14 = arith.constant 0 : index
    %c0_15 = arith.constant 0 : index
    %15 = vector.load %arg2[%c0_13, %c2, %c0_14, %c0_15] : memref<1x5x8x128xf32, #tpu.memory_space<vmem>>, vector<1x1x8x128xf32>
    %16 = vector.shape_cast %15 : vector<1x1x8x128xf32> to vector<8x128xf32>
    %cst_16 = arith.constant 2.000000e+00 : f32
    %17 = vector.broadcast %cst_16 : f32 to vector<8x128xf32>
    %18 = arith.cmpf oeq, %1, %17 : vector<8x128xf32>
    %19 = arith.select %18, %16, %14 : vector<8x128xi1>, vector<8x128xf32>
    %c0_17 = arith.constant 0 : index
    %c3 = arith.constant 3 : index
    %c0_18 = arith.constant 0 : index
    %c0_19 = arith.constant 0 : index
    %20 = vector.load %arg2[%c0_17, %c3, %c0_18, %c0_19] : memref<1x5x8x128xf32, #tpu.memory_space<vmem>>, vector<1x1x8x128xf32>
    %21 = vector.shape_cast %20 : vector<1x1x8x128xf32> to vector<8x128xf32>
    %cst_20 = arith.constant 3.000000e+00 : f32
    %22 = vector.broadcast %cst_20 : f32 to vector<8x128xf32>
    %23 = arith.cmpf oeq, %1, %22 : vector<8x128xf32>
    %24 = arith.select %23, %21, %19 : vector<8x128xi1>, vector<8x128xf32>
    %c0_21 = arith.constant 0 : index
    %c4 = arith.constant 4 : index
    %c0_22 = arith.constant 0 : index
    %c0_23 = arith.constant 0 : index
    %25 = vector.load %arg2[%c0_21, %c4, %c0_22, %c0_23] : memref<1x5x8x128xf32, #tpu.memory_space<vmem>>, vector<1x1x8x128xf32>
    %26 = vector.shape_cast %25 : vector<1x1x8x128xf32> to vector<8x128xf32>
    %cst_24 = arith.constant 4.000000e+00 : f32
    %27 = vector.broadcast %cst_24 : f32 to vector<8x128xf32>
    %28 = arith.cmpf oeq, %1, %27 : vector<8x128xf32>
    %29 = arith.select %28, %26, %24 : vector<8x128xi1>, vector<8x128xf32>
    %cst_25 = arith.constant 9.99999991E-38 : f32
    %30 = vector.broadcast %cst_25 : f32 to vector<8x128xf32>
    %31 = arith.maximumf %29, %30 : vector<8x128xf32>
    %32 = math.log %31 : vector<8x128xf32>
    %cst_26 = arith.constant 0.000000e+00 : f32
    %33 = vector.broadcast %cst_26 : f32 to vector<8x128xf32>
    %34 = arith.subf %33, %32 : vector<8x128xf32>
    %cst_27 = arith.constant 4.000000e-01 : f32
    %35 = vector.broadcast %cst_27 : f32 to vector<8x128xf32>
    %36 = arith.mulf %34, %35 : vector<8x128xf32>
    %37 = arith.select %3, %36, %34 : vector<8x128xi1>, vector<8x128xf32>
    %c0_28 = arith.constant 0 : index
    %c0_29 = arith.constant 0 : index
    %c0_30 = arith.constant 0 : index
    %c0_31 = arith.constant 0 : index
    %38 = vector.load %arg5[%c0_28, %c0_29, %c0_30, %c0_31] : memref<1x2x8x128xf32, #tpu.memory_space<vmem>>, vector<1x1x8x128xf32>
    %39 = vector.shape_cast %38 : vector<1x1x8x128xf32> to vector<8x128xf32>
    %c0_32 = arith.constant 0 : index
    %c0_33 = arith.constant 0 : index
    %c0_34 = arith.constant 0 : index
    %c0_35 = arith.constant 0 : index
    %40 = vector.load %arg4[%c0_32, %c0_33, %c0_34, %c0_35] : memref<1x2x8x128xf32, #tpu.memory_space<vmem>>, vector<1x1x8x128xf32>
    %41 = vector.shape_cast %40 : vector<1x1x8x128xf32> to vector<8x128xf32>
    %42 = arith.subf %39, %41 : vector<8x128xf32>
    %c0_36 = arith.constant 0 : index
    %c1_37 = arith.constant 1 : index
    %c0_38 = arith.constant 0 : index
    %c0_39 = arith.constant 0 : index
    %43 = vector.load %arg5[%c0_36, %c1_37, %c0_38, %c0_39] : memref<1x2x8x128xf32, #tpu.memory_space<vmem>>, vector<1x1x8x128xf32>
    %44 = vector.shape_cast %43 : vector<1x1x8x128xf32> to vector<8x128xf32>
    %c0_40 = arith.constant 0 : index
    %c1_41 = arith.constant 1 : index
    %c0_42 = arith.constant 0 : index
    %c0_43 = arith.constant 0 : index
    %45 = vector.load %arg4[%c0_40, %c1_41, %c0_42, %c0_43] : memref<1x2x8x128xf32, #tpu.memory_space<vmem>>, vector<1x1x8x128xf32>
    %46 = vector.shape_cast %45 : vector<1x1x8x128xf32> to vector<8x128xf32>
    %47 = arith.subf %44, %46 : vector<8x128xf32>
    %48 = arith.mulf %42, %42 : vector<8x128xf32>
    %49 = arith.mulf %47, %47 : vector<8x128xf32>
    %50 = arith.addf %48, %49 : vector<8x128xf32>
    %cst_44 = arith.constant dense<true> : vector<8x128xi1>
    %51 = arith.xori %3, %cst_44 : vector<8x128xi1>
    %52 = vector.shape_cast %37 : vector<8x128xf32> to vector<1x8x128xf32>
    %cst_45 = arith.constant dense<0.000000e+00> : vector<8x128xf32>
    %53 = vector.multi_reduction <add>, %52, %cst_45 [0] : vector<1x8x128xf32> to vector<8x128xf32>
    %cst_46 = arith.constant 0.000000e+00 : f32
    %54 = vector.broadcast %cst_46 : f32 to vector<8x128xf32>
    %55 = arith.select %51, %50, %54 : vector<8x128xi1>, vector<8x128xf32>
    %56 = vector.shape_cast %55 : vector<8x128xf32> to vector<1x8x128xf32>
    %cst_47 = arith.constant dense<0.000000e+00> : vector<8x128xf32>
    %57 = vector.multi_reduction <add>, %56, %cst_47 [0] : vector<1x8x128xf32> to vector<8x128xf32>
    %58 = arith.extui %51 : vector<8x128xi1> to vector<8x128xi32>
    %59 = arith.sitofp %58 : vector<8x128xi32> to vector<8x128xf32>
    %60 = vector.shape_cast %59 : vector<8x128xf32> to vector<1x8x128xf32>
    %cst_48 = arith.constant dense<0.000000e+00> : vector<8x128xf32>
    %61 = vector.multi_reduction <add>, %60, %cst_48 [0] : vector<1x8x128xf32> to vector<8x128xf32>
    %c0_49 = arith.constant 0 : index
    %c0_50 = arith.constant 0 : index
    %c0_51 = arith.constant 0 : index
    %c0_52 = arith.constant 0 : index
    %62 = vector.load %arg6[%c0_49, %c0_50, %c0_51, %c0_52] : memref<1x1x8x128xf32, #tpu.memory_space<vmem>>, vector<1x1x8x128xf32>
    %63 = vector.shape_cast %62 : vector<1x1x8x128xf32> to vector<8x128xf32>
    %64 = vector.shape_cast %53 : vector<8x128xf32> to vector<1x1x8x128xf32>
    tpu.vector_store %arg6[%c0_49, %c0_50, %c0_51, %c0_52], %64 {strides = array<i32>} : memref<1x1x8x128xf32, #tpu.memory_space<vmem>>, vector<1x1x8x128xf32>,
    %c0_53 = arith.constant 0 : index
    %c0_54 = arith.constant 0 : index
    %c0_55 = arith.constant 0 : index
    %c0_56 = arith.constant 0 : index
    %65 = vector.load %arg7[%c0_53, %c0_54, %c0_55, %c0_56] : memref<1x1x8x128xf32, #tpu.memory_space<vmem>>, vector<1x1x8x128xf32>
    %66 = vector.shape_cast %65 : vector<1x1x8x128xf32> to vector<8x128xf32>
    %67 = vector.shape_cast %57 : vector<8x128xf32> to vector<1x1x8x128xf32>
    tpu.vector_store %arg7[%c0_53, %c0_54, %c0_55, %c0_56], %67 {strides = array<i32>} : memref<1x1x8x128xf32, #tpu.memory_space<vmem>>, vector<1x1x8x128xf32>,
    %c0_57 = arith.constant 0 : index
    %c0_58 = arith.constant 0 : index
    %c0_59 = arith.constant 0 : index
    %c0_60 = arith.constant 0 : index
    %68 = vector.load %arg8[%c0_57, %c0_58, %c0_59, %c0_60] : memref<1x1x8x128xf32, #tpu.memory_space<vmem>>, vector<1x1x8x128xf32>
    %69 = vector.shape_cast %68 : vector<1x1x8x128xf32> to vector<8x128xf32>
    %70 = vector.shape_cast %61 : vector<8x128xf32> to vector<1x1x8x128xf32>
    tpu.vector_store %arg8[%c0_57, %c0_58, %c0_59, %c0_60], %70 {strides = array<i32>} : memref<1x1x8x128xf32, #tpu.memory_space<vmem>>, vector<1x1x8x128xf32>,
    return
  }
  func.func @transform_0(%arg0: i32, %arg1: i32) -> (i32, i32, i32, i32) {
    %c0_i32 = arith.constant 0 : i32
    %c0_i32_0 = arith.constant 0 : i32
    %c0_i32_1 = arith.constant 0 : i32
    return %arg0, %c0_i32, %arg1, %c0_i32_0 : i32, i32, i32, i32
  }
  func.func @transform_1(%arg0: i32, %arg1: i32) -> (i32, i32, i32, i32) {
    %c0_i32 = arith.constant 0 : i32
    %c0_i32_0 = arith.constant 0 : i32
    %c0_i32_1 = arith.constant 0 : i32
    return %arg0, %c0_i32, %arg1, %c0_i32_0 : i32, i32, i32, i32
  }
  func.func @transform_2(%arg0: i32, %arg1: i32) -> (i32, i32, i32, i32) {
    %c0_i32 = arith.constant 0 : i32
    %c0_i32_0 = arith.constant 0 : i32
    %c0_i32_1 = arith.constant 0 : i32
    return %arg0, %c0_i32, %arg1, %c0_i32_0 : i32, i32, i32, i32
  }
  func.func @transform_3(%arg0: i32, %arg1: i32) -> (i32, i32, i32, i32) {
    %c0_i32 = arith.constant 0 : i32
    %c0_i32_0 = arith.constant 0 : i32
    %c0_i32_1 = arith.constant 0 : i32
    return %arg0, %c0_i32, %arg1, %c0_i32_0 : i32, i32, i32, i32
  }
  func.func @transform_4(%arg0: i32, %arg1: i32) -> (i32, i32, i32, i32) {
    %c0_i32 = arith.constant 0 : i32
    %c0_i32_0 = arith.constant 0 : i32
    %c0_i32_1 = arith.constant 0 : i32
    return %arg0, %arg1, %c0_i32, %c0_i32_0 : i32, i32, i32, i32
  }
  func.func @transform_5(%arg0: i32, %arg1: i32) -> (i32, i32, i32, i32) {
    %c0_i32 = arith.constant 0 : i32
    %c0_i32_0 = arith.constant 0 : i32
    %c0_i32_1 = arith.constant 0 : i32
    return %arg0, %arg1, %c0_i32, %c0_i32_0 : i32, i32, i32, i32
  }
  func.func @transform_6(%arg0: i32, %arg1: i32) -> (i32, i32, i32, i32) {
    %c0_i32 = arith.constant 0 : i32
    %c0_i32_0 = arith.constant 0 : i32
    %c0_i32_1 = arith.constant 0 : i32
    return %arg0, %arg1, %c0_i32, %c0_i32_0 : i32, i32, i32, i32
  }
}

</mosaic_0001>

<bundles_post_ra>
// kernel: tpu_custom_call.1
= control target key start
LH: loop header
LB: loop body
LE: loop exit
PB: predicated region body
PF: predicated region fallthrough
CT: control target
= control target key end

     0   :  { %s1622_s0 = inlined_call_operand.hbm [shape: f32[2,5,8,128], index: 0, kind: input, shape index: {}]   ;;  %s1623_s1 = inlined_call_operand.hbm [shape: f32[2,1,8,128], index: 1, kind: input, shape index: {}]   ;;  %s1624_s2 = inlined_call_operand.hbm [shape: f32[2,2,8,128], index: 2, kind: input, shape index: {}]   ;;  %s1625_s3 = inlined_call_operand.hbm [shape: f32[2,2,8,128], index: 3, kind: input, shape index: {}]   ;;  %s1626_s4 = inlined_call_operand.hbm [shape: f32[2,1,8,128], index: 4, kind: output, shape index: {0}]   ;;  %s1627_s5 = inlined_call_operand.hbm [shape: f32[2,1,8,128], index: 5, kind: output, shape index: {1}]   ;;  %s1628_s6 = inlined_call_operand.hbm [shape: f32[2,1,8,128], index: 6, kind: output, shape index: {2}]  }
   0x1   :  { %1636 = sst [smem:[#allocation23_spill]] %s1622_s0 }
   0x2   :  { %1637 = sst [smem:[#allocation24_spill]] %s1623_s1 }
   0x3   :  { %12 = vsyncpa [#allocation3], 0 }
   0x4   :  { %14 = vsyncpa [#allocation3 + $0x1], 0 }
   0x5   :  { %15 = vsyncpa [#allocation6], 0 }
   0x6   :  { %17 = vsyncpa [#allocation6 + $0x1], 0 }
   0x7   :  { %18 = vsyncpa [#allocation9], 0 }
   0x8   :  { %20 = vsyncpa [#allocation9 + $0x1], 0 }
   0x9   :  { %21 = vsyncpa [#allocation4], 0 }
   0xa   :  { %23 = vsyncpa [#allocation4 + $0x1], 0 }
   0xb   :  { %24 = vsyncpa [#allocation12], 0 }
   0xc   :  { %26 = vsyncpa [#allocation12 + $0x1], 0  ;;  %s1198_s21 = smov 0   ;;  %s1200_s22 = smov 0  }
   0xd   :  { %s1202_s23 = smov 0   ;;  %s1204_s24 = smov 0  }
   0xe   :  { %s1206_s25 = smov 0   ;;  %s1208_s26 = smov 0  }
   0xf LB: > { %1638 = sst [smem:[#allocation19_spill]] %s1138_s23  ;;  %s1229_s27 = sadd.s32 4294967295, %s1150_s26   ;;  %s1150_s26 = sphi %s1208_s26, %s32_s26   ;;  %s1146_s25 = sphi %s1206_s25, %s1670_s25   ;;  %s1142_s24 = sphi %s1204_s24, %s1669_s24   ;;  %s1138_s23 = sphi %s1202_s23, %s1665_s23   ;;  %s1134_s22 = sphi %s1200_s22, %s1668_s22   ;;  %s1130_s21 = sphi %s1198_s21, %s1667_s21  }
  0x10   : > { %1639 = sst [smem:[#allocation20_spill]] %s1150_s26  ;;  %s1629_s28 = sadd.s32 4294967294, %s1150_s26  }
  0x11   : > { %s44_s29 = sadd.s32 1, %s1146_s25  ;;  %s53_s30 = sadd.s32 1, %s1138_s23 }
  0x12   : > { %p46_p0 = scmp.ge.s32.totalorder %s44_s29, 2  ;;  %p60_p1 = scmp.ne.s32.totalorder %s1138_s23, %s1134_s22 }
  0x13   : > { %p61_p2 = scmp.eq.s32.totalorder %s1150_s26, 0  ;;  %p66_p3 = scmp.ne.s32.totalorder %s1134_s22, %s1130_s21 }
  0x14   : > { %s1672_s29 = smov (%p46_p0, %s44_s29), 0  ;;  %p67_p5 = scmp.eq.s32.totalorder %s1229_s27, 0 }
  0x15   : > { %1640 = sst [smem:[#allocation21_spill]] %s1672_s29  ;;  %p1241_p4 = por %p61_p2, %p60_p1 }
  0x16   : > { %s48_s8 = ssub.s32 %s1146_s25, %s1672_s29  ;;  %p176_p6 = scmp.eq.s32.totalorder %s1229_s27, 1 }
  0x17   : > { %p51_p7 = scmp.eq.s32.totalorder %s48_s8, 0  ;;  %p1249_p8 = por %p67_p5, %p66_p3 }
  0x18   : > { %p1253_p9 = por %p176_p6, %p60_p1  ;;  %p182_p10 = scmp.eq.s32.totalorder %s1629_s28, 1 }
  0x19   : > { %s1642_s9 = scalar_select %p1249_p8, 1, 0 }
  0x1a   : > { %s1643_s10 = scalar_select %p1253_p9, 1, 0 }
  0x1b   : > { %s1260_s11 = scalar_select %p51_p7, %s1138_s23, %s53_s30  }
  0x1c   : > { %p1262_p11 = por %p182_p10, %p66_p3  ;;  %p824_p13 = scmp.lt.s32.totalorder %s1150_s26, 2 }
  0x1d   : > { %1644 = sst [smem:[#allocation22_spill]] %s1260_s11  ;;  %s1269_s13 = sand.u32 1, %s1138_s23  }
  0x1e   : > { %s1645_s12 = scalar_select %p1262_p11, 1, 0 }
  0x1f   : > { %s280_s14 = sand.u32 1, %s1150_s26   ;;  %s752_s15 = sshll.u32 %s1269_s13, 3 }
  0x20   : > { %p1275_p0 = pnand %p824_p13, %p1241_p4  ;;  %s753_s17 = sshll.u32 %s1146_s25, 7 }
  0x21   : > { %s1647_s1 = sld [smem:[#allocation24_spill]]  ;;  %s284_s30 = scalar_lea.vmem [#allocation5], %s752_s15 }
  0x22   : > { %s292_s8 = sshll.u32 %s284_s30, 4  ;;  %s1289_s7 = scalar_lea.sflag [#allocation6], %s280_s14  ;;  %s1286_s8 = int_to_ptr.vmem [resolvable:$true] %s292_s8 }
  0x23   : > { %p1295_p4 = pneg %p1275_p0 }
  0x27   : > { %s1283_s20 = scalar_lea.hbm %s1647_s1, %s753_s17  ;;  %s885_s18 = scalar_lea.hbm %s1647_s1, 256 }
  0x28   : > { %s880_s28 = scalar_lea.hbm %s1283_s20, 128  ;;  %p886_p7 = scmp.lt.u32.totalorder %s1283_s20, %s1647_s1 }
  0x29   : > { %p881_p3 = scmp.ne.s32.totalorder %s1283_s20, %s880_s28  ;;  %p887_p10 = scmp.lt.u32.totalorder %s885_s18, %s880_s28 }
  0x2a   : > { %p889_p12 = scmp.lt.u32.totalorder %s880_s28, %s1283_s20 }
  0x2b   : > { %p883_p5 = pnand %p1295_p4, %p881_p3  ;;  %p888_p13 = por %p887_p10, %p886_p7 }
  0x2d   : > { %p884_p6 = pneg %p883_p5  ;;  %p890_p1 = por %p889_p12, %p888_p13 }
  0x2f   : > { %p891_p2 = pnand %p890_p1, %p884_p6 }
  0x31   : > { %894 = shalt.err (!%p891_p2)
}
  0x32   : > { %s895_s14 = scalar_lea.vmem %s1286_s8, 128  ;;  %s1152_s17 = smov [#allocation5]  }
  0x33   : > { %p896_p3 = scmp.ne.s32.totalorder %s1286_s8, %s895_s14  ;;  %s900_s15 = sshll.u32 %s1152_s17, 4  ;;  %s901_s15 = int_to_ptr.vmem [resolvable:$false] %s900_s15 }
  0x34   : > { %s902_s19 = scalar_lea.vmem %s901_s15, 256  ;;  %p903_p9 = scmp.lt.s32.totalorder %s1286_s8, %s901_s15 }
  0x35   : > { %p898_p5 = pnand %p896_p3, %p1295_p4  ;;  %p904_p8 = scmp.lt.s32.totalorder %s902_s19, %s895_s14 }
  0x37   : > { %p899_p11 = pneg %p898_p5  ;;  %p905_p7 = por %p904_p8, %p903_p9 }
  0x39   : > { %p906_p10 = pnand %p905_p7, %p899_p11 }
  0x3b   : > { %909 = shalt.err (!%p906_p10)
}
  0x3c   : > { %807 = dma.hbm_to_vmem [thread:$0]  (!%p1275_p0), %s1283_s20, 128, %s1286_s8, %s1289_s7  }
  0x3d   : > { %p1649_p12 = scmp.lt.s32.totalorder %s1150_s26, 3  ;;  %p1650_p1 = scmp.ge.s32.totalorder %s1150_s26, 1 }
  0x3e   : > { %s784_s18 = smul.u32 40, %s1269_s13  ;;  %s1652_s0 = sld [smem:[#allocation23_spill]] }
  0x3f   : > { %p1323_p2 = pnand %p1650_p1, %p1649_p12  ;;  %s785_s30 = smul.u32 640, %s1146_s25 }
  0x40   : > { %s262_s1 = scalar_lea.vmem [#allocation2], %s784_s18  ;;  %s259_s8 = scalar_lea.sflag [#allocation3], %s1269_s13 }
  0x41   : > { %s1651_s28 = scalar_select %p1323_p2, 1, 0 }
  0x42   : > { %s270_s20 = sshll.u32 %s262_s1, 4  ;;  %s1335_s20 = int_to_ptr.vmem [resolvable:$true] %s270_s20 }
  0x44   : > { %s1333_s19 = scalar_lea.hbm %s1652_s0, %s785_s30  ;;  %s915_s17 = scalar_lea.hbm %s1652_s0, 1280 }
  0x45   : > { %s910_s11 = scalar_lea.hbm %s1333_s19, 640  ;;  %p916_p6 = scmp.lt.u32.totalorder %s1333_s19, %s1652_s0 }
  0x46   : > { %p911_p8 = scmp.ne.s32.totalorder %s1333_s19, %s910_s11  ;;  %p917_p13 = scmp.lt.u32.totalorder %s915_s17, %s910_s11 }
  0x47   : > { %p919_p5 = scmp.lt.u32.totalorder %s910_s11, %s1333_s19 }
  0x48   : > { %p913_p9 = pnand %p911_p8, %p1295_p4  ;;  %p918_p3 = por %p917_p13, %p916_p6 }
  0x4a   : > { %p914_p11 = pneg %p913_p9  ;;  %p920_p7 = por %p919_p5, %p918_p3 }
  0x4c   : > { %p921_p10 = pnand %p920_p7, %p914_p11 }
  0x4e   : > { %924 = shalt.err (!%p921_p10)
}
  0x4f   : > { %s925_s1 = scalar_lea.vmem %s1335_s20, 640  ;;  %s1153_s23 = smov [#allocation2]  }
  0x50   : > { %p926_p12 = scmp.ne.s32.totalorder %s1335_s20, %s925_s1  ;;  %s930_s18 = sshll.u32 %s1153_s23, 4  ;;  %s931_s18 = int_to_ptr.vmem [resolvable:$false] %s930_s18 }
  0x51   : > { %s932_s14 = scalar_lea.vmem %s931_s18, 1280  ;;  %p933_p9 = scmp.lt.s32.totalorder %s1335_s20, %s931_s18 }
  0x52   : > { %p928_p1 = pnand %p926_p12, %p1295_p4  ;;  %p934_p2 = scmp.lt.s32.totalorder %s932_s14, %s925_s1 }
  0x54   : > { %p929_p8 = pneg %p928_p1  ;;  %p935_p6 = por %p934_p2, %p933_p9 }
  0x56   : > { %p936_p13 = pnand %p935_p6, %p929_p8 }
  0x58   : > { %939 = shalt.err (!%p936_p13)
}
  0x59   : > { %s1154_s11 = smov 128   ;;  %s1155_s17 = smov 8  }
  0x5a   : > { %804 = dma.hbm_to_vmem [thread:$0]  (!%p1275_p0), %s1333_s19, 640, %s1335_s20, %s259_s8, %s1154_s11, %s1154_s11, %s1155_s17  }
  0x5b   : > { %s782_s30 = sshll.u32 %s1146_s25, 8  ;;  %s1653_s15 = sshll.u32 %s1269_s13, 4 }
  0x5c   : > { %s303_s1 = scalar_lea.vmem [#allocation7], %s1653_s15  ;;  %s1372_s0 = scalar_lea.hbm %s1624_s2, %s782_s30 }
  0x5d   : > { %s311_s23 = sshll.u32 %s303_s1, 4  ;;  %s940_s26 = scalar_lea.hbm %s1372_s0, 256  ;;  %s1374_s23 = int_to_ptr.vmem [resolvable:$true] %s311_s23 }
  0x5e   : > { %p941_p2 = scmp.ne.s32.totalorder %s1372_s0, %s940_s26  ;;  %s945_s8 = scalar_lea.hbm %s1624_s2, 512 }
  0x5f   : > { %p946_p5 = scmp.lt.u32.totalorder %s1372_s0, %s1624_s2  ;;  %p947_p7 = scmp.lt.u32.totalorder %s945_s8, %s940_s26 }
  0x60   : > { %p943_p11 = pnand %p941_p2, %p1295_p4  ;;  %p949_p12 = scmp.lt.u32.totalorder %s940_s26, %s1372_s0 }
  0x61   : > { %p948_p10 = por %p947_p7, %p946_p5 }
  0x62   : > { %p944_p3 = pneg %p943_p11 }
  0x63   : > { %p950_p1 = por %p949_p12, %p948_p10 }
  0x65   : > { %p951_p8 = pnand %p950_p1, %p944_p3 }
  0x67   : > { %954 = shalt.err (!%p951_p8)
}
  0x68   : > { %s955_s18 = scalar_lea.vmem %s1374_s23, 256  ;;  %s1156_s14 = smov [#allocation7]  }
  0x69   : > { %p956_p9 = scmp.ne.s32.totalorder %s1374_s23, %s955_s18  ;;  %s960_s19 = sshll.u32 %s1156_s14, 4  ;;  %s961_s19 = int_to_ptr.vmem [resolvable:$false] %s960_s19 }
  0x6a   : > { %s962_s20 = scalar_lea.vmem %s961_s19, 512  ;;  %p963_p2 = scmp.lt.s32.totalorder %s1374_s23, %s961_s19 }
  0x6b   : > { %p958_p6 = pnand %p956_p9, %p1295_p4  ;;  %p964_p11 = scmp.lt.s32.totalorder %s962_s20, %s955_s18 }
  0x6d   : > { %p959_p13 = pneg %p958_p6  ;;  %p965_p5 = por %p964_p11, %p963_p2 }
  0x6f   : > { %p966_p7 = pnand %p965_p5, %p959_p13 }
  0x71   : > { %969 = shalt.err (!%p966_p7)
}
  0x72   : > { %810 = dma.hbm_to_vmem [thread:$0]  (!%p1275_p0), %s1372_s0, 256, %s1374_s23, %s1289_s7, %s1154_s11, %s1154_s11, %s1155_s17  }
  0x73   : > { %s1406_s15 = scalar_lea.hbm %s1625_s3, %s782_s30  ;;  %s1654_s1 = sshll.u32 %s1269_s13, 4 }
  0x74   : > { %s325_s18 = scalar_lea.vmem [#allocation8], %s1654_s1  ;;  %s322_s19 = scalar_lea.sflag [#allocation9], %s1269_s13 }
  0x75   : > { %s333_s14 = sshll.u32 %s325_s18, 4  ;;  %s970_s20 = scalar_lea.hbm %s1406_s15, 256  ;;  %s1410_s14 = int_to_ptr.vmem [resolvable:$true] %s333_s14 }
  0x76   : > { %p971_p3 = scmp.ne.s32.totalorder %s1406_s15, %s970_s20  ;;  %s975_s30 = scalar_lea.hbm %s1625_s3, 512 }
  0x77   : > { %p976_p1 = scmp.lt.u32.totalorder %s1406_s15, %s1625_s3  ;;  %p977_p8 = scmp.lt.u32.totalorder %s975_s30, %s970_s20 }
  0x78   : > { %p973_p10 = pnand %p971_p3, %p1295_p4  ;;  %p979_p6 = scmp.lt.u32.totalorder %s970_s20, %s1406_s15 }
  0x79   : > { %p978_p9 = por %p977_p8, %p976_p1 }
  0x7a   : > { %p974_p12 = pneg %p973_p10 }
  0x7b   : > { %p980_p13 = por %p979_p6, %p978_p9 }
  0x7d   : > { %p981_p2 = pnand %p980_p13, %p974_p12 }
  0x7f   : > { %984 = shalt.err (!%p981_p2)
}
  0x80   : > { %s985_s8 = scalar_lea.vmem %s1410_s14, 256  ;;  %s1157_s1 = smov [#allocation8]  }
  0x81   : > { %p986_p11 = scmp.ne.s32.totalorder %s1410_s14, %s985_s8  ;;  %s990_s18 = sshll.u32 %s1157_s1, 4  ;;  %s991_s18 = int_to_ptr.vmem [resolvable:$false] %s990_s18 }
  0x82   : > { %s992_s0 = scalar_lea.vmem %s991_s18, 512  ;;  %p993_p3 = scmp.lt.s32.totalorder %s1410_s14, %s991_s18 }
  0x83   : > { %p988_p5 = pnand %p986_p11, %p1295_p4  ;;  %p994_p10 = scmp.lt.s32.totalorder %s992_s0, %s985_s8 }
  0x85   : > { %p989_p7 = pneg %p988_p5  ;;  %p995_p1 = por %p994_p10, %p993_p3 }
  0x87   : > { %p996_p8 = pnand %p995_p1, %p989_p7 }
  0x89   : > { %999 = shalt.err (!%p996_p8)
}
  0x8a   : > { %813 = dma.hbm_to_vmem [thread:$0]  (!%p1275_p0), %s1406_s15, 256, %s1410_s14, %s322_s19, %s1154_s11, %s1154_s11, %s1155_s17  }
  0x8b   : > { %p1655_p4 = scmp.ne.s32.totalorder %s1651_s28, 0 }
  0x8c   : > { %s1442_s29 = sand.u32 (!%p1655_p4), 1, %s1134_s22   ;;  %p1656_p12 = scmp.ne.s32.totalorder (!%p1655_p4), %s1642_s9, 0 }
  0x8d   : > { %345 = sbr.rel (%p1655_p4) target bundleno = 230 (0xe6), region = 36  ;;  %s348_s7 = scalar_lea.sflag (!%p1655_p4), [#allocation3], %s1442_s29 }
  0x8e   : > { %s786_s20 = smul.u32 (!%p1655_p4), 40, %s1442_s29 }
  0x90   : > { %s1446_s16 = scalar_lea.vmem (!%p1655_p4), [#allocation2], %s786_s20 }
  0x94   : > { %1109 = dma.done.wait (%p1656_p12), %s348_s7, 640  }
  0x95   : > { %1111 = vsyncadd (%p1656_p12), %s348_s7, 4294966656  ;;  %s356_s13 = sand.u32 1, %s1229_s27   ;;  %s1454_s28 = sshll.u32 %s1442_s29, 3 }
  0x96   : > { %s357_s11 = scalar_lea.sflag [#allocation6], %s356_s13  ;;  %s360_s17 = scalar_lea.vmem [#allocation5], %s1454_s28 }
  0x97   : > { %1113 = dma.done.wait (%p1656_p12), %s357_s11, 384  }
  0x98   : > { %1115 = vsyncadd (%p1656_p12), %s357_s11, 4294966912  ;;  %s762_s15 = sshll.u32 %s1442_s29, 4  ;;  %s375_s19 = scalar_lea.sflag [#allocation9], %s1442_s29 }
  0x99   : > { %s369_s14 = scalar_lea.vmem [#allocation7], %s762_s15  ;;  %s378_s30 = scalar_lea.vmem [#allocation8], %s762_s15 }
  0x9a   : > { %1117 = dma.done.wait (%p1656_p12), %s375_s19, 256  }
  0x9b   : > { %1119 = vsyncadd (%p1656_p12), %s375_s19, 4294967040  ;;  %v1469_v0 = vld [vmem:[%s360_s17] sm:$0xff]  ;;  %v434_v1 = vld [vmem:[%s1446_s16] sm:$0xff]  ;;  %vm1158_vm3 = vmmov 1   ;;  %v1159_v15 = vmov 0.0   ;;  %s424_s9 = scalar_lea.vmem [#allocation11], %s1454_s28 }
  0x9c   : > { %v767_v2 = vld [vmem:[%s1446_s16 + $0x8] sm:$0xff]  ;;  %vm433_vm0 = vcmp.eq.f32.partialorder %v1469_v0, 0.0  ;;  %vm438_vm1 = vcmp.eq.f32.partialorder %v1469_v0, 1.0  ;;  %v768_v3 = vld [vmem:[%s1446_s16 + $0x10] sm:$0xff]  ;;  %vm442_vm2 = vcmp.eq.f32.partialorder %v1469_v0, 2.0  ;;  %vm446_vm5 = vcmp.eq.f32.partialorder %v1469_v0, 3.0 }
  0x9d   : > { %v458_v4 = vld [vmem:[%s378_s30] sm:$0xff]  ;;  %v435_v6 = vsel %vm433_vm0, %v434_v1, 0.0  ;;  %v771_v8 = vld [vmem:[%s378_s30 + $0x8] sm:$0xff]  ;;  %vm1481_vm4 = vmxor %vm433_vm0, %vm1158_vm3  ;;  %vm450_vm6 = vcmp.eq.f32.partialorder %v1469_v0, 4.0  ;;  %s518_s23 = sshll.u32 %s424_s9, 4  ;;  %s431_s26 = scalar_lea.vmem [#allocation13], %s1454_s28  ;;  %s1498_s23 = int_to_ptr.vmem [resolvable:$true] %s518_s23 }
  0x9e   : > { %v459_v5 = vld [vmem:[%s369_s14] sm:$0xff]  ;;  %v772_v9 = vld [vmem:[%s369_s14 + $0x8] sm:$0xff]  ;;  %v439_v11 = vsel %vm438_vm1, %v767_v2, %v435_v6  ;;  %v769_v13 = vld [vmem:[%s1446_s16 + $0x18] sm:$0xff]  ;;  %v773_v16 = vsel %vm1481_vm4, 1.0, %v1159_v15  ;;  %s1496_s8 = sshll.u32 %s1142_s24, 7  ;;  %s532_s1 = sshll.u32 %s431_s26, 4  ;;  %s1508_s1 = int_to_ptr.vmem [resolvable:$true] %s532_s1 }
  0x9f   : > { %v460_v7 = vsub.f32 %v458_v4, %v459_v5  ;;  %v465_v12 = vsub.f32 %v771_v8, %v772_v9  ;;  %v770_v14 = vld [vmem:[%s1446_s16 + $0x20] sm:$0xff]  ;;  %v443_v17 = vsel %vm442_vm2, %v768_v3, %v439_v11  ;;  %478 = vst [vmem:[%s431_s26] sm:$0xff] %v773_v16  ;;  %s1504_s20 = scalar_lea.hbm %s1627_s5, %s1496_s8  ;;  %s1514_s16 = scalar_lea.hbm %s1628_s6, %s1496_s8 }
  0xa0   : > { %v447_v20 = vsel %vm446_vm5, %v769_v13, %v443_v17  ;;  %s1518_s11 = scalar_lea.sflag [#allocation12], %s356_s13  ;;  %s1000_s17 = scalar_lea.vmem %s1498_s23, 128 }
  0xa1   : > { %v466_v18 = vmul.f32 %v460_v7, %v460_v7  ;;  %v467_v19 = vmul.f32 %v465_v12, %v465_v12  ;;  %v451_v21 = vsel %vm450_vm6, %v770_v14, %v447_v20  ;;  %p1001_p0 = scmp.ne.s32.totalorder %s1498_s23, %s1000_s17  ;;  %p1659_p9 = scmp.ne.s32.totalorder %s1643_s10, 0 }
  0xa2   : > { %v452_v23 = vmax.f32 %v451_v21, 1e-37  ;;  %s1160_s15 = smov [#allocation11]  }
  0xa3   : > { %v468_v22 = vadd.f32 %v467_v19, %v466_v18  ;;  %p1002_p6 = pnand %p1001_p0, %p1659_p9  ;;  %s1004_s14 = sshll.u32 %s1160_s15, 4  ;;  %s1005_s14 = int_to_ptr.vmem [resolvable:$false] %s1004_s14 }
  0xa4   : > { %878 = vlog2.f32 %v452_v23  ;;  %s1006_s19 = scalar_lea.vmem %s1005_s14, 256  ;;  %p1007_p2 = scmp.lt.s32.totalorder %s1498_s23, %s1005_s14 }
  0xa5   : > { %v471_v24 = vsel %vm1481_vm4, %v468_v22, 0.0  ;;  %p1003_p13 = pneg %p1002_p6  ;;  %p1008_p11 = scmp.lt.s32.totalorder %s1006_s19, %s1000_s17 }
  0xa6   : > { %477 = vst [vmem:[%s424_s9] sm:$0xff] %v471_v24 }
  0xa7   : > { %p1009_p5 = por %p1008_p11, %p1007_p2 }
  0xa9   : > { %p1010_p7 = pnand %p1009_p5, %p1003_p13 }
  0xab   : > { %1013 = shalt.err (!%p1010_p7)
}
  0xac   : > { %s1014_s27 = scalar_lea.hbm %s1504_s20, 128  ;;  %s1018_s9 = scalar_lea.hbm %s1627_s5, 256 }
  0xad   : > { %p1015_p3 = scmp.ne.s32.totalorder %s1504_s20, %s1014_s27  ;;  %p1019_p8 = scmp.lt.u32.totalorder %s1504_s20, %s1627_s5 }
  0xae   : > { %p1020_p4 = scmp.lt.u32.totalorder %s1018_s9, %s1014_s27  ;;  %p1022_p0 = scmp.lt.u32.totalorder %s1014_s27, %s1504_s20 }
  0xaf   : > { %p1016_p10 = pnand %p1015_p3, %p1659_p9 }
  0xb0   : > { %p1021_p12 = por %p1020_p4, %p1019_p8 }
  0xb1   : > { %p1017_p1 = pneg %p1016_p10 }
  0xb2   : > { %p1023_p6 = por %p1022_p0, %p1021_p12 }
  0xb4   : > { %p1024_p13 = pnand %p1023_p6, %p1017_p1 }
  0xb6   : > { %1027 = shalt.err (!%p1024_p13)
}
  0xb7   : > { %796 = dma.vmem_to_hbm [thread:$0]  (%p1659_p9), %s1498_s23, 128, %s1504_s20, %s1518_s11  }
  0xb8   : > { %s1028_s0 = scalar_lea.vmem %s1508_s1, 128  ;;  %s1161_s24 = smov [#allocation13]  }
  0xb9   : > { %p1029_p2 = scmp.ne.s32.totalorder %s1508_s1, %s1028_s0  ;;  %s1032_s7 = sshll.u32 %s1161_s24, 4  ;;  %s1033_s7 = int_to_ptr.vmem [resolvable:$false] %s1032_s7 }
  0xba   : > { %s1034_s17 = scalar_lea.vmem %s1033_s7, 256  ;;  %p1035_p7 = scmp.lt.s32.totalorder %s1508_s1, %s1033_s7 }
  0xbb   : > { %p1030_p11 = pnand %p1029_p2, %p1659_p9  ;;  %p1036_p3 = scmp.lt.s32.totalorder %s1034_s17, %s1028_s0 }
  0xbd   : > { %p1031_p5 = pneg %p1030_p11  ;;  %p1037_p10 = por %p1036_p3, %p1035_p7 }
  0xbf   : > { %p1038_p1 = pnand %p1037_p10, %p1031_p5 }
  0xc1   : > { %1041 = shalt.err (!%p1038_p1)
}
  0xc2   : > { %s1042_s23 = scalar_lea.hbm %s1514_s16, 128  ;;  %s1046_s14 = scalar_lea.hbm %s1628_s6, 256 }
  0xc3   : > { %p1043_p8 = scmp.ne.s32.totalorder %s1514_s16, %s1042_s23  ;;  %p1047_p0 = scmp.lt.u32.totalorder %s1514_s16, %s1628_s6 }
  0xc4   : > { %p1048_p6 = scmp.lt.u32.totalorder %s1046_s14, %s1042_s23  ;;  %p1050_p2 = scmp.lt.u32.totalorder %s1042_s23, %s1514_s16 }
  0xc5   : > { %p1044_p4 = pnand %p1043_p8, %p1659_p9 }
  0xc6   : > { %p1049_p13 = por %p1048_p6, %p1047_p0 }
  0xc7   : > { %p1045_p12 = pneg %p1044_p4 }
  0xc8   : > { %p1051_p11 = por %p1050_p2, %p1049_p13 }
  0xca   : > { %p1052_p5 = pnand %p1051_p11, %p1045_p12 }
  0xcc   : > { %1055 = shalt.err (!%p1052_p5)
}
  0xcd   : > { %797 = dma.vmem_to_hbm [thread:$0]  (%p1659_p9), %s1508_s1, 128, %s1514_s16, %s1518_s11   ;;  %v879_v25 = vpop.eup %878 }
  0xce   : > { %v454_v26 = vmul.f32 0.6931472, %v879_v25  ;;  %s417_s13 = scalar_lea.vmem [#allocation10], %s1454_s28  ;;  %s1571_s18 = scalar_lea.hbm %s1626_s4, %s1496_s8 }
  0xcf   : > { %s504_s30 = sshll.u32 %s417_s13, 4  ;;  %s480_s1 = scalar_lea.sflag [#allocation4], %s1442_s29  ;;  %s1565_s30 = int_to_ptr.vmem [resolvable:$true] %s504_s30 }
  0xd0   : > { %v455_v27 = vsub.f32 0.0, %v454_v26  ;;  %s1056_s16 = scalar_lea.vmem %s1565_s30, 128  ;;  %s1162_s28 = smov [#allocation10]  }
  0xd1   : > { %p1057_p7 = scmp.ne.s32.totalorder %s1565_s30, %s1056_s16  ;;  %s1060_s11 = sshll.u32 %s1162_s28, 4  ;;  %s1061_s11 = int_to_ptr.vmem [resolvable:$false] %s1060_s11 }
  0xd2   : > { %v456_v28 = vmul.f32 0.4, %v455_v27  ;;  %s1062_s0 = scalar_lea.vmem %s1061_s11, 256  ;;  %p1063_p1 = scmp.lt.s32.totalorder %s1565_s30, %s1061_s11 }
  0xd3   : > { %p1058_p3 = pnand %p1057_p7, %p1659_p9  ;;  %p1064_p8 = scmp.lt.s32.totalorder %s1062_s0, %s1056_s16 }
  0xd4   : > { %v457_v29 = vsel %vm433_vm0, %v456_v28, %v455_v27 }
  0xd5   : > { %476 = vst [vmem:[%s417_s13] sm:$0xff] %v457_v29  ;;  %p1059_p10 = pneg %p1058_p3  ;;  %p1065_p4 = por %p1064_p8, %p1063_p1 }
  0xd7   : > { %p1066_p12 = pnand %p1065_p4, %p1059_p10 }
  0xd9   : > { %1069 = shalt.err (!%p1066_p12)
}
  0xda   : > { %s1070_s29 = scalar_lea.hbm %s1571_s18, 128  ;;  %s1074_s7 = scalar_lea.hbm %s1626_s4, 256 }
  0xdb   : > { %p1071_p0 = scmp.ne.s32.totalorder %s1571_s18, %s1070_s29  ;;  %p1075_p2 = scmp.lt.u32.totalorder %s1571_s18, %s1626_s4 }
  0xdc   : > { %p1076_p11 = scmp.lt.u32.totalorder %s1074_s7, %s1070_s29  ;;  %p1078_p7 = scmp.lt.u32.totalorder %s1070_s29, %s1571_s18 }
  0xdd   : > { %p1072_p6 = pnand %p1071_p0, %p1659_p9 }
  0xde   : > { %p1077_p5 = por %p1076_p11, %p1075_p2 }
  0xdf   : > { %p1073_p13 = pneg %p1072_p6 }
  0xe0   : > { %p1079_p3 = por %p1078_p7, %p1077_p5 }
  0xe2   : > { %p1080_p10 = pnand %p1079_p3, %p1073_p13 }
  0xe4   : > { %1083 = shalt.err (!%p1080_p10)
}
  0xe5   : > { %795 = dma.vmem_to_hbm [thread:$0]  (%p1659_p9), %s1565_s30, 128, %s1571_s18, %s480_s1  }
  0xe6 PF: > { %s1660_s20 = sld [smem:[#allocation20_spill]]  ;;  %s544_s15 = sand.u32 1, %s1130_s21  }
  0xe7   : > { %p1661_p1 = scmp.ne.s32.totalorder %s1645_s12, 0  ;;  %s545_s14 = scalar_lea.sflag [#allocation4], %s544_s15 }
  0xec   : > { %p1662_p8 = scmp.ge.s32.totalorder %s1660_s20, 2 }
  0xee   : > { %p815_p4 = pnand %p1662_p8, %p1661_p1 }
  0xf0   : > { %1121 = dma.done.wait (!%p815_p4), %s545_s14, 128  }
  0xf1   : > { %1123 = vsyncadd (!%p815_p4), %s545_s14, 4294967168  ;;  %s1663_s19 = sadd.s32 4294967294, %s1660_s20  }
  0xf2   : > { %s553_s27 = sand.u32 1, %s1663_s19  }
  0xf3   : > { %s554_s13 = scalar_lea.sflag [#allocation12], %s553_s27 }
  0xf4   : > { %1125 = dma.done.wait (!%p815_p4), %s554_s13, 256  }
  0xf5   : > { %1127 = vsyncadd (!%p815_p4), %s554_s13, 4294967040  ;;  %s32_s26 = sadd.s32 1, %s1660_s20   ;;  %s1664_s10 = sld [smem:[#allocation19_spill]] }
  0xf6   : > { %p29_p9 = scmp.ge.s32.totalorder %s32_s26, 4   ;;  %s1665_s23 = sld [smem:[#allocation22_spill]] }
  0xf7   : > { %s1666_s30 = sld [smem:[#allocation21_spill]]  ;;  %s1667_s21 = smov %s1134_s22 }
  0xf8   : > { %s1669_s24 = smov %s1146_s25  ;;  %31 = sbr.rel (!%p29_p9) target bundleno = 15 (0xf), region = 156 }
  0xfb   : > { %s1668_s22 = smov %s1664_s10 }
  0xfd   : > { %s1670_s25 = smov %s1666_s30 }
  0xff   :  { %568 = vsyncpa [#allocation3], 1 }
 0x100   :  { %570 = vsyncpa [#allocation3 + $0x1], 1 }
 0x101   :  { %571 = vsyncpa [#allocation6], 1 }
 0x102   :  { %573 = vsyncpa [#allocation6 + $0x1], 1 }
 0x103   :  { %574 = vsyncpa [#allocation9], 1 }
 0x104   :  { %576 = vsyncpa [#allocation9 + $0x1], 1 }
 0x105   :  { %577 = vsyncpa [#allocation4], 1 }
 0x106   :  { %579 = vsyncpa [#allocation4 + $0x1], 1 }
 0x107   :  { %580 = vsyncpa [#allocation12], 1 }
 0x108   :  { %582 = vsyncpa [#allocation12 + $0x1], 1 }

</bundles_post_ra>
